<compile_context>
chip_gen: v6e
topology: v6e:2x2x1
jax: 0.10.0
libtpu: 0.0.40
codegen_flags: <defaults>
</compile_context>

<pallas_src>
import functools
import math

import jax
import jax.numpy as jnp
from jax.experimental import pallas as pl
from jax.experimental.pallas import tpu as pltpu


# --------------------------------------------------------------------------
# Stage 1: hoisted K/V projections (computed once per token, not per q-tile)
# --------------------------------------------------------------------------
def _kv_proj_kernel(xk_ref, xv_ref, wk_ref, bk_ref, wv_ref, bv_ref,
                    k_ref, v_ref):
    k_ref[0] = (jnp.dot(xk_ref[0], wk_ref[...],
                        preferred_element_type=jnp.float32)
                + bk_ref[...]).astype(k_ref.dtype)
    v_ref[0] = (jnp.dot(xv_ref[0], wv_ref[...],
                        preferred_element_type=jnp.float32)
                + bv_ref[...]).astype(v_ref.dtype)


def _project_kv(xk, xv, wk_t, bk, wv_t, bv, *, ts, vmem_limit):
    B, S, D = xk.shape
    d_kv = wk_t.shape[1]
    n_s = S // ts
    return pl.pallas_call(
        _kv_proj_kernel,
        out_shape=(jax.ShapeDtypeStruct((B, S, d_kv), xk.dtype),
                   jax.ShapeDtypeStruct((B, S, d_kv), xv.dtype)),
        grid_spec=pltpu.PrefetchScalarGridSpec(
            num_scalar_prefetch=0,
            grid=(B, n_s),
            in_specs=[
                pl.BlockSpec((1, ts, D), lambda b, s: (b, s, 0)),   # xk tile
                pl.BlockSpec((1, ts, D), lambda b, s: (b, s, 0)),   # xv tile
                pl.BlockSpec((D, d_kv), lambda b, s: (0, 0)),       # Wk^T
                pl.BlockSpec((1, d_kv), lambda b, s: (0, 0)),       # bk
                pl.BlockSpec((D, d_kv), lambda b, s: (0, 0)),       # Wv^T
                pl.BlockSpec((1, d_kv), lambda b, s: (0, 0)),       # bv
            ],
            out_specs=[pl.BlockSpec((1, ts, d_kv), lambda b, s: (b, s, 0)),
                       pl.BlockSpec((1, ts, d_kv), lambda b, s: (b, s, 0))],
        ),
        compiler_params=pltpu.CompilerParams(
            dimension_semantics=("parallel", "parallel"),
            vmem_limit_bytes=vmem_limit),
    )(xk, xv, wk_t, bk, wv_t, bv)


# --------------------------------------------------------------------------
# Stage 2: flash-style multi-query attention (+ fused Q / output projections)
# --------------------------------------------------------------------------
def _mqa_flash_kernel(xq_ref, k_ref, v_ref, wq_ref, bq_ref, wo_ref, bo_ref,
                      out_ref, q_scr, m_scr, l_scr, acc_scr,
                      *, h, d_k, scale):
    """One grid step == (batch b, query tile s, K/V tile t).

    xq_ref : (1, tq, D)     query activations (block index constant over t)
    k_ref  : (1, tk, d_k)   projected keys tile   (shared by all heads)
    v_ref  : (1, tk, d_k)   projected values tile (shared by all heads)
    wq_ref : (h, D, d_k)    host-pre-split Wq^T        bq_ref : (h, 1, d_k)
    wo_ref : (D, D)         Wo^T                       bo_ref : (1, D)
    out_ref: (1, tq, D)     written only at the last K/V tile
    q_scr  : (h, tq, d_k)   head-major scaled queries (filled at t == 0)
    m_scr / l_scr : (h, tq, 1) online-softmax running max / sum (f32)
    acc_scr: (h, tq, d_k)   online-softmax running numerator (f32)
    """
    t = pl.program_id(2)
    compute_dtype = xq_ref.dtype
    tk = k_ref.shape[1]

    @pl.when(t == 0)
    def _init():
        m_scr[...] = jnp.full(m_scr.shape, -jnp.inf, dtype=m_scr.dtype)
        l_scr[...] = jnp.zeros(l_scr.shape, dtype=l_scr.dtype)
        acc_scr[...] = jnp.zeros(acc_scr.shape, dtype=acc_scr.dtype)
        xq = xq_ref[0]                                        # (tq, D)
        # Per-head Q projection (full K = D contraction each) written straight
        # into head-major scratch; Wq is pre-split on the host, so there is no
        # lane-slicing of q at head*d_k boundaries and no layout shuffles.
        # 1/sqrt(d_k) is folded into q once here.
        for head in range(h):
            q_h = (jnp.dot(xq, wq_ref[head],
                           preferred_element_type=jnp.float32)
                   + bq_ref[head]) * scale
            q_scr[head] = q_h.astype(q_scr.dtype)

    # ---- online-softmax step over this K/V tile, all heads batched ----
    q = q_scr[...]                                             # (h, tq, d_k)
    k = jnp.broadcast_to(k_ref[...], (h, tk, d_k)).astype(compute_dtype)
    v = jnp.broadcast_to(v_ref[...], (h, tk, d_k)).astype(compute_dtype)

    s = jnp.einsum("hqd,hkd->hqk", q, k,                      # 'nt' form,
                   preferred_element_type=jnp.float32)        # no K transpose
    m_prev = m_scr[...]
    m_new = jnp.maximum(m_prev, jnp.max(s, axis=-1, keepdims=True))
    alpha = jnp.exp(m_prev - m_new)
    p = jnp.exp(s - m_new)
    l_scr[...] = alpha * l_scr[...] + jnp.sum(p, axis=-1, keepdims=True)
    acc_scr[...] = alpha * acc_scr[...] + jnp.einsum(
        "hqk,hkd->hqd", p.astype(compute_dtype), v,
        preferred_element_type=jnp.float32)
    m_scr[...] = m_new

    @pl.when(t == pl.num_programs(2) - 1)
    def _finalize():
        o = acc_scr[...] * pl.reciprocal(l_scr[...], approx=True)  # (h,tq,d_k)
        o = o.astype(compute_dtype)
        # Concatenate heads along the feature axis as values (no scratch slab,
        # no masked partial stores) and run ONE output projection with full
        # contraction K = D.
        o_cat = jnp.concatenate([o[head] for head in range(h)], axis=-1)
        out = (jnp.dot(o_cat, wo_ref[...],
                       preferred_element_type=jnp.float32) + bo_ref[...])
        out_ref[0] = out.astype(out_ref.dtype)


def _pick_vmem_limit():
    """~7/8 of this chip's VMEM, capped at 112 MiB (big scoped limit on
    v5e/v6e 128 MiB parts; ~56 MiB on the 64 MiB v7x part)."""
    try:
        cap = int(pltpu.get_tpu_info().vmem_capacity_bytes)
        limit = min((cap * 7) // 8, 112 * 1024 * 1024)
        if limit > 0:
            return limit
    except Exception:
        pass
    return 48 * 1024 * 1024     # conservative fallback, safe on every part


def multi_query_attention(xq, xk, xv, params, *, h, block_q=512, block_k=512,
                          single_buffer_weights=True, vmem_limit_bytes=None):
    """Pallas-backed forward of MultiQueryAttention.

    xq, xk, xv : (B, S, d_model)
    params     : PyTorch-convention Linear params:
                 wq (D, D), bq (D,), wk (d_k, D), bk (d_k,),
                 wv (d_k, D), bv (d_k,), wo (D, D), bo (D,)
    """
    B, S, D = xq.shape
    assert D % h == 0
    d_k = D // h
    tq = min(S, block_q)
    tk = min(S, block_k)
    # TODO(synk): no padding/masking path -- ragged sequence lengths need
    # S % tile == 0 (pad on the host if necessary).
    assert S % tq == 0 and S % tk == 0
    n_q, n_k = S // tq, S // tk
    if vmem_limit_bytes is None:
        vmem_limit_bytes = _pick_vmem_limit()
    compute_dtype = xq.dtype

    # ---- host-side weight prep (pre-transposed to (in, out)) ----
    wq_t = params["wq"].T                                          # (D, D)
    wq_split = jnp.transpose(wq_t.reshape(D, h, d_k), (1, 0, 2))   # (h, D, d_k)
    bq_split = params["bq"].reshape(h, 1, d_k)
    wk_t = params["wk"].T                                          # (D, d_k)
    wv_t = params["wv"].T
    bk = params["bk"].reshape(1, d_k)
    bv = params["bv"].reshape(1, d_k)
    wo_t = params["wo"].T                                          # (D, D)
    bo = params["bo"].reshape(1, D)
    # TODO(synk): on v7x with D >= 2048, pre-cast weights (and activations) to
    # bf16 to halve resident weight VMEM and hit the fast MXU path.

    # ---- stage 1: hoisted K/V projections (once per token) ----
    k_proj, v_proj = _project_kv(xk, xv, wk_t, bk, wv_t, bv,
                                 ts=tq, vmem_limit=vmem_limit_bytes)

    # ---- stage 2: flash-style MQA with fused Q / output projections ----
    kernel = functools.partial(_mqa_flash_kernel, h=h, d_k=d_k,
                               scale=1.0 / math.sqrt(d_k))

    def const_spec(shape):
        # Constant index_map => pipelining buys nothing; single-buffer to halve
        # the resident weight VMEM (matters most on v7x's 64 MiB).
        zero = (0,) * len(shape)
        if single_buffer_weights:
            return pl.BlockSpec(shape, lambda b, s, t: zero,
                                pipeline_mode=pl.Buffered(1))
        return pl.BlockSpec(shape, lambda b, s, t: zero)

    return pl.pallas_call(
        kernel,
        out_shape=jax.ShapeDtypeStruct((B, S, D), xq.dtype),
        grid_spec=pltpu.PrefetchScalarGridSpec(
            num_scalar_prefetch=0,
            grid=(B, n_q, n_k),
            in_specs=[
                pl.BlockSpec((1, tq, D), lambda b, s, t: (b, s, 0)),    # xq
                pl.BlockSpec((1, tk, d_k), lambda b, s, t: (b, t, 0)),  # k tile
                pl.BlockSpec((1, tk, d_k), lambda b, s, t: (b, t, 0)),  # v tile
                const_spec((h, D, d_k)),    # Wq^T split per head
                const_spec((h, 1, d_k)),    # bq split per head
                const_spec((D, D)),         # Wo^T
                const_spec((1, D)),         # bo
            ],
            out_specs=pl.BlockSpec((1, tq, D), lambda b, s, t: (b, s, 0)),
            scratch_shapes=[
                pltpu.VMEM((h, tq, d_k), compute_dtype),   # head-major q
                pltpu.VMEM((h, tq, 1), jnp.float32),       # running max
                pltpu.VMEM((h, tq, 1), jnp.float32),       # running sum
                pltpu.VMEM((h, tq, d_k), jnp.float32),     # running numerator
            ],
        ),
        compiler_params=pltpu.CompilerParams(
            # v7x has 2 TensorCores: with B == 1 pick block_q <= S // 2 so the
            # parallel (b, s) axes expose work for both cores.
            dimension_semantics=("parallel", "parallel", "arbitrary"),
            vmem_limit_bytes=vmem_limit_bytes),
    )(xq, k_proj, v_proj, wq_split, bq_split, wo_t, bo)


# --------------------------------------------------------------------------
# Pure-JAX reference + test harness
# --------------------------------------------------------------------------
def _reference(xq, xk, xv, params, *, h):
    B, S, D = xq.shape
    d_k = D // h
    q = xq @ params["wq"].T + params["bq"]                 # (B, S, D)
    k = xk @ params["wk"].T + params["bk"]                 # (B, S, d_k)
    v = xv @ params["wv"].T + params["bv"]                 # (B, S, d_k)
    q = q.reshape(B, S, h, d_k).transpose(0, 2, 1, 3)      # (B, h, S, d_k)
    scores = jnp.einsum("bhqd,bkd->bhqk", q, k) / math.sqrt(d_k)
    p = jax.nn.softmax(scores, axis=-1)
    out = jnp.einsum("bhqk,bkd->bhqd", p, v)               # (B, h, S, d_k)
    out = out.transpose(0, 2, 1, 3).reshape(B, S, D)
    return out @ params["wo"].T + params["bo"]


def _init_params(key, d_model, d_k):
    ks = jax.random.split(key, 8)
    bound = 1.0 / math.sqrt(d_model)
    u = lambda k, shape: jax.random.uniform(k, shape, jnp.float32, -bound, bound)
    return {
        "wq": u(ks[0], (d_model, d_model)), "bq": u(ks[1], (d_model,)),
        "wk": u(ks[2], (d_k, d_model)),     "bk": u(ks[3], (d_k,)),
        "wv": u(ks[4], (d_k, d_model)),     "bv": u(ks[5], (d_k,)),
        "wo": u(ks[6], (d_model, d_model)), "bo": u(ks[7], (d_model,)),
    }


if __name__ == "__main__":
    B, S, d_model, h = 2, 16, 128, 4
    d_k = d_model // h

    key = jax.random.PRNGKey(0)
    kq, kk, kv, kp = jax.random.split(key, 4)
    xq = jax.random.normal(kq, (B, S, d_model), jnp.float32)
    xk = jax.random.normal(kk, (B, S, d_model), jnp.float32)
    xv = jax.random.normal(kv, (B, S, d_model), jnp.float32)
    params = _init_params(kp, d_model, d_k)

    # Small tiles so the test exercises BOTH the query-tile axis and the
    # online-softmax K/V reduction axis (grid = (2, 2, 2)).
    run = functools.partial(multi_query_attention, xq, xk, xv, params,
                            h=h, block_q=8, block_k=8)
    try:
        out = jax.block_until_ready(run())
    except Exception:
        # Fallback if this jax build rejects BlockSpec(pipeline_mode=...):
        # identical numerics with default double-buffered weights.
        out = jax.block_until_ready(run(single_buffer_weights=False))

    ref = _reference(xq, xk, xv, params, h=h)
    assert out.shape == (B, S, d_model)
    # Tolerance covers the approximate (EUP) reciprocal used for the softmax
    # denominator; everything else accumulates in f32.
    assert jnp.allclose(out, ref, rtol=5e-3, atol=5e-3), "mismatch vs reference"

    print("KERNEL_OK")
</pallas_src>

<mosaic_0001>
module attributes {stable_mosaic.version = 11 : i64} {
  func.func @_kv_proj_kernel(%arg0: i32, %arg1: i32, %arg2: memref<1x8x128xf32, #tpu.memory_space<vmem>>, %arg3: memref<1x8x128xf32, #tpu.memory_space<vmem>>, %arg4: memref<128x32xf32, #tpu.memory_space<vmem>>, %arg5: memref<1x32xf32, #tpu.memory_space<vmem>>, %arg6: memref<128x32xf32, #tpu.memory_space<vmem>>, %arg7: memref<1x32xf32, #tpu.memory_space<vmem>>, %arg8: memref<1x8x32xf32, #tpu.memory_space<vmem>>, %arg9: memref<1x8x32xf32, #tpu.memory_space<vmem>>) attributes {dimension_semantics = [#tpu.dimension_semantics<parallel>, #tpu.dimension_semantics<parallel>], iteration_bounds = array<i64: 2, 2>, scalar_prefetch = 0 : i64, scratch_operands = 0 : i64, tpu.core_type = #tpu.core_type<tc>, window_params = [{transform_indices = @transform_0, window_bounds = array<i64: 1, 8, 128>}, {transform_indices = @transform_1, window_bounds = array<i64: 1, 8, 128>}, {pipeline_mode = #tpu.pipeline_mode<synchronous>, transform_indices = @transform_2, window_bounds = array<i64: 128, 32>}, {pipeline_mode = #tpu.pipeline_mode<synchronous>, transform_indices = @transform_3, window_bounds = array<i64: 1, 32>}, {pipeline_mode = #tpu.pipeline_mode<synchronous>, transform_indices = @transform_4, window_bounds = array<i64: 128, 32>}, {pipeline_mode = #tpu.pipeline_mode<synchronous>, transform_indices = @transform_5, window_bounds = array<i64: 1, 32>}, {transform_indices = @transform_6, window_bounds = array<i64: 1, 8, 32>}, {transform_indices = @transform_7, window_bounds = array<i64: 1, 8, 32>}]} {
    %c0 = arith.constant 0 : index
    %c0_0 = arith.constant 0 : index
    %c0_1 = arith.constant 0 : index
    %0 = vector.load %arg2[%c0, %c0_0, %c0_1] : memref<1x8x128xf32, #tpu.memory_space<vmem>>, vector<1x8x128xf32>
    %1 = vector.shape_cast %0 : vector<1x8x128xf32> to vector<8x128xf32>
    %c0_2 = arith.constant 0 : index
    %c0_3 = arith.constant 0 : index
    %2 = vector.load %arg4[%c0_2, %c0_3] : memref<128x32xf32, #tpu.memory_space<vmem>>, vector<128x32xf32>
    %cst = arith.constant dense<0.000000e+00> : vector<8x32xf32>
    %3 = tpu.matmul %1, %2, %cst {dimension_numbers = #tpu.dot_dimension_numbers<[1], [0], [0], [1], [0, 0, 1, 1], [], []>} : vector<8x128xf32>, vector<128x32xf32>, vector<8x32xf32> -> vector<8x32xf32>
    %c0_4 = arith.constant 0 : index
    %c0_5 = arith.constant 0 : index
    %4 = vector.load %arg5[%c0_4, %c0_5] : memref<1x32xf32, #tpu.memory_space<vmem>>, vector<1x32xf32>
    %5 = vector.broadcast %4 : vector<1x32xf32> to vector<8x32xf32>
    %6 = arith.addf %3, %5 : vector<8x32xf32>
    %c0_6 = arith.constant 0 : index
    %c0_7 = arith.constant 0 : index
    %c0_8 = arith.constant 0 : index
    %7 = vector.load %arg8[%c0_6, %c0_7, %c0_8] : memref<1x8x32xf32, #tpu.memory_space<vmem>>, vector<1x8x32xf32>
    %8 = vector.shape_cast %7 : vector<1x8x32xf32> to vector<8x32xf32>
    %9 = vector.shape_cast %6 : vector<8x32xf32> to vector<1x8x32xf32>
    tpu.vector_store %arg8[%c0_6, %c0_7, %c0_8], %9 {strides = array<i32>} : memref<1x8x32xf32, #tpu.memory_space<vmem>>, vector<1x8x32xf32>,
    %c0_9 = arith.constant 0 : index
    %c0_10 = arith.constant 0 : index
    %c0_11 = arith.constant 0 : index
    %10 = vector.load %arg3[%c0_9, %c0_10, %c0_11] : memref<1x8x128xf32, #tpu.memory_space<vmem>>, vector<1x8x128xf32>
    %11 = vector.shape_cast %10 : vector<1x8x128xf32> to vector<8x128xf32>
    %c0_12 = arith.constant 0 : index
    %c0_13 = arith.constant 0 : index
    %12 = vector.load %arg6[%c0_12, %c0_13] : memref<128x32xf32, #tpu.memory_space<vmem>>, vector<128x32xf32>
    %cst_14 = arith.constant dense<0.000000e+00> : vector<8x32xf32>
    %13 = tpu.matmul %11, %12, %cst_14 {dimension_numbers = #tpu.dot_dimension_numbers<[1], [0], [0], [1], [0, 0, 1, 1], [], []>} : vector<8x128xf32>, vector<128x32xf32>, vector<8x32xf32> -> vector<8x32xf32>
    %c0_15 = arith.constant 0 : index
    %c0_16 = arith.constant 0 : index
    %14 = vector.load %arg7[%c0_15, %c0_16] : memref<1x32xf32, #tpu.memory_space<vmem>>, vector<1x32xf32>
    %15 = vector.broadcast %14 : vector<1x32xf32> to vector<8x32xf32>
    %16 = arith.addf %13, %15 : vector<8x32xf32>
    %c0_17 = arith.constant 0 : index
    %c0_18 = arith.constant 0 : index
    %c0_19 = arith.constant 0 : index
    %17 = vector.load %arg9[%c0_17, %c0_18, %c0_19] : memref<1x8x32xf32, #tpu.memory_space<vmem>>, vector<1x8x32xf32>
    %18 = vector.shape_cast %17 : vector<1x8x32xf32> to vector<8x32xf32>
    %19 = vector.shape_cast %16 : vector<8x32xf32> to vector<1x8x32xf32>
    tpu.vector_store %arg9[%c0_17, %c0_18, %c0_19], %19 {strides = array<i32>} : memref<1x8x32xf32, #tpu.memory_space<vmem>>, vector<1x8x32xf32>,
    return
  }
  func.func @transform_0(%arg0: i32, %arg1: i32) -> (i32, i32, i32) {
    %c0_i32 = arith.constant 0 : i32
    %c0_i32_0 = arith.constant 0 : i32
    return %arg0, %arg1, %c0_i32 : i32, i32, i32
  }
  func.func @transform_1(%arg0: i32, %arg1: i32) -> (i32, i32, i32) {
    %c0_i32 = arith.constant 0 : i32
    %c0_i32_0 = arith.constant 0 : i32
    return %arg0, %arg1, %c0_i32 : i32, i32, i32
  }
  func.func @transform_2(%arg0: i32, %arg1: i32) -> (i32, i32) {
    %c0_i32 = arith.constant 0 : i32
    %c0_i32_0 = arith.constant 0 : i32
    %c0_i32_1 = arith.constant 0 : i32
    return %c0_i32, %c0_i32_0 : i32, i32
  }
  func.func @transform_3(%arg0: i32, %arg1: i32) -> (i32, i32) {
    %c0_i32 = arith.constant 0 : i32
    %c0_i32_0 = arith.constant 0 : i32
    %c0_i32_1 = arith.constant 0 : i32
    return %c0_i32, %c0_i32_0 : i32, i32
  }
  func.func @transform_4(%arg0: i32, %arg1: i32) -> (i32, i32) {
    %c0_i32 = arith.constant 0 : i32
    %c0_i32_0 = arith.constant 0 : i32
    %c0_i32_1 = arith.constant 0 : i32
    return %c0_i32, %c0_i32_0 : i32, i32
  }
  func.func @transform_5(%arg0: i32, %arg1: i32) -> (i32, i32) {
    %c0_i32 = arith.constant 0 : i32
    %c0_i32_0 = arith.constant 0 : i32
    %c0_i32_1 = arith.constant 0 : i32
    return %c0_i32, %c0_i32_0 : i32, i32
  }
  func.func @transform_6(%arg0: i32, %arg1: i32) -> (i32, i32, i32) {
    %c0_i32 = arith.constant 0 : i32
    %c0_i32_0 = arith.constant 0 : i32
    return %arg0, %arg1, %c0_i32 : i32, i32, i32
  }
  func.func @transform_7(%arg0: i32, %arg1: i32) -> (i32, i32, i32) {
    %c0_i32 = arith.constant 0 : i32
    %c0_i32_0 = arith.constant 0 : i32
    return %arg0, %arg1, %c0_i32 : i32, i32, i32
  }
}

module attributes {stable_mosaic.version = 11 : i64} {
  func.func @_kv_proj_kernel(%arg0: i32, %arg1: i32, %arg2: memref<1x8x128xf32, #tpu.memory_space<vmem>>, %arg3: memref<1x8x128xf32, #tpu.memory_space<vmem>>, %arg4: memref<128x32xf32, #tpu.memory_space<vmem>>, %arg5: memref<1x32xf32, #tpu.memory_space<vmem>>, %arg6: memref<128x32xf32, #tpu.memory_space<vmem>>, %arg7: memref<1x32xf32, #tpu.memory_space<vmem>>, %arg8: memref<1x8x32xf32, #tpu.memory_space<vmem>>, %arg9: memref<1x8x32xf32, #tpu.memory_space<vmem>>) attributes {dimension_semantics = [#tpu.dimension_semantics<parallel>, #tpu.dimension_semantics<parallel>], iteration_bounds = array<i64: 2, 2>, scalar_prefetch = 0 : i64, scratch_operands = 0 : i64, tpu.core_type = #tpu.core_type<tc>, window_params = [{transform_indices = @transform_0, window_bounds = array<i64: 1, 8, 128>}, {transform_indices = @transform_1, window_bounds = array<i64: 1, 8, 128>}, {pipeline_mode = #tpu.pipeline_mode<synchronous>, transform_indices = @transform_2, window_bounds = array<i64: 128, 32>}, {pipeline_mode = #tpu.pipeline_mode<synchronous>, transform_indices = @transform_3, window_bounds = array<i64: 1, 32>}, {pipeline_mode = #tpu.pipeline_mode<synchronous>, transform_indices = @transform_4, window_bounds = array<i64: 128, 32>}, {pipeline_mode = #tpu.pipeline_mode<synchronous>, transform_indices = @transform_5, window_bounds = array<i64: 1, 32>}, {transform_indices = @transform_6, window_bounds = array<i64: 1, 8, 32>}, {transform_indices = @transform_7, window_bounds = array<i64: 1, 8, 32>}]} {
    %c0 = arith.constant 0 : index
    %c0_0 = arith.constant 0 : index
    %c0_1 = arith.constant 0 : index
    %0 = vector.load %arg2[%c0, %c0_0, %c0_1] : memref<1x8x128xf32, #tpu.memory_space<vmem>>, vector<1x8x128xf32>
    %1 = vector.shape_cast %0 : vector<1x8x128xf32> to vector<8x128xf32>
    %c0_2 = arith.constant 0 : index
    %c0_3 = arith.constant 0 : index
    %2 = vector.load %arg4[%c0_2, %c0_3] : memref<128x32xf32, #tpu.memory_space<vmem>>, vector<128x32xf32>
    %cst = arith.constant dense<0.000000e+00> : vector<8x32xf32>
    %3 = tpu.matmul %1, %2, %cst {dimension_numbers = #tpu.dot_dimension_numbers<[1], [0], [0], [1], [0, 0, 1, 1], [], []>} : vector<8x128xf32>, vector<128x32xf32>, vector<8x32xf32> -> vector<8x32xf32>
    %c0_4 = arith.constant 0 : index
    %c0_5 = arith.constant 0 : index
    %4 = vector.load %arg5[%c0_4, %c0_5] : memref<1x32xf32, #tpu.memory_space<vmem>>, vector<1x32xf32>
    %5 = vector.broadcast %4 : vector<1x32xf32> to vector<8x32xf32>
    %6 = arith.addf %3, %5 : vector<8x32xf32>
    %c0_6 = arith.constant 0 : index
    %c0_7 = arith.constant 0 : index
    %c0_8 = arith.constant 0 : index
    %7 = vector.load %arg8[%c0_6, %c0_7, %c0_8] : memref<1x8x32xf32, #tpu.memory_space<vmem>>, vector<1x8x32xf32>
    %8 = vector.shape_cast %7 : vector<1x8x32xf32> to vector<8x32xf32>
    %9 = vector.shape_cast %6 : vector<8x32xf32> to vector<1x8x32xf32>
    tpu.vector_store %arg8[%c0_6, %c0_7, %c0_8], %9 {strides = array<i32>} : memref<1x8x32xf32, #tpu.memory_space<vmem>>, vector<1x8x32xf32>,
    %c0_9 = arith.constant 0 : index
    %c0_10 = arith.constant 0 : index
    %c0_11 = arith.constant 0 : index
    %10 = vector.load %arg3[%c0_9, %c0_10, %c0_11] : memref<1x8x128xf32, #tpu.memory_space<vmem>>, vector<1x8x128xf32>
    %11 = vector.shape_cast %10 : vector<1x8x128xf32> to vector<8x128xf32>
    %c0_12 = arith.constant 0 : index
    %c0_13 = arith.constant 0 : index
    %12 = vector.load %arg6[%c0_12, %c0_13] : memref<128x32xf32, #tpu.memory_space<vmem>>, vector<128x32xf32>
    %cst_14 = arith.constant dense<0.000000e+00> : vector<8x32xf32>
    %13 = tpu.matmul %11, %12, %cst_14 {dimension_numbers = #tpu.dot_dimension_numbers<[1], [0], [0], [1], [0, 0, 1, 1], [], []>} : vector<8x128xf32>, vector<128x32xf32>, vector<8x32xf32> -> vector<8x32xf32>
    %c0_15 = arith.constant 0 : index
    %c0_16 = arith.constant 0 : index
    %14 = vector.load %arg7[%c0_15, %c0_16] : memref<1x32xf32, #tpu.memory_space<vmem>>, vector<1x32xf32>
    %15 = vector.broadcast %14 : vector<1x32xf32> to vector<8x32xf32>
    %16 = arith.addf %13, %15 : vector<8x32xf32>
    %c0_17 = arith.constant 0 : index
    %c0_18 = arith.constant 0 : index
    %c0_19 = arith.constant 0 : index
    %17 = vector.load %arg9[%c0_17, %c0_18, %c0_19] : memref<1x8x32xf32, #tpu.memory_space<vmem>>, vector<1x8x32xf32>
    %18 = vector.shape_cast %17 : vector<1x8x32xf32> to vector<8x32xf32>
    %19 = vector.shape_cast %16 : vector<8x32xf32> to vector<1x8x32xf32>
    tpu.vector_store %arg9[%c0_17, %c0_18, %c0_19], %19 {strides = array<i32>} : memref<1x8x32xf32, #tpu.memory_space<vmem>>, vector<1x8x32xf32>,
    return
  }
  func.func @transform_0(%arg0: i32, %arg1: i32) -> (i32, i32, i32) {
    %c0_i32 = arith.constant 0 : i32
    %c0_i32_0 = arith.constant 0 : i32
    return %arg0, %arg1, %c0_i32 : i32, i32, i32
  }
  func.func @transform_1(%arg0: i32, %arg1: i32) -> (i32, i32, i32) {
    %c0_i32 = arith.constant 0 : i32
    %c0_i32_0 = arith.constant 0 : i32
    return %arg0, %arg1, %c0_i32 : i32, i32, i32
  }
  func.func @transform_2(%arg0: i32, %arg1: i32) -> (i32, i32) {
    %c0_i32 = arith.constant 0 : i32
    %c0_i32_0 = arith.constant 0 : i32
    %c0_i32_1 = arith.constant 0 : i32
    return %c0_i32, %c0_i32_0 : i32, i32
  }
  func.func @transform_3(%arg0: i32, %arg1: i32) -> (i32, i32) {
    %c0_i32 = arith.constant 0 : i32
    %c0_i32_0 = arith.constant 0 : i32
    %c0_i32_1 = arith.constant 0 : i32
    return %c0_i32, %c0_i32_0 : i32, i32
  }
  func.func @transform_4(%arg0: i32, %arg1: i32) -> (i32, i32) {
    %c0_i32 = arith.constant 0 : i32
    %c0_i32_0 = arith.constant 0 : i32
    %c0_i32_1 = arith.constant 0 : i32
    return %c0_i32, %c0_i32_0 : i32, i32
  }
  func.func @transform_5(%arg0: i32, %arg1: i32) -> (i32, i32) {
    %c0_i32 = arith.constant 0 : i32
    %c0_i32_0 = arith.constant 0 : i32
    %c0_i32_1 = arith.constant 0 : i32
    return %c0_i32, %c0_i32_0 : i32, i32
  }
  func.func @transform_6(%arg0: i32, %arg1: i32) -> (i32, i32, i32) {
    %c0_i32 = arith.constant 0 : i32
    %c0_i32_0 = arith.constant 0 : i32
    return %arg0, %arg1, %c0_i32 : i32, i32, i32
  }
  func.func @transform_7(%arg0: i32, %arg1: i32) -> (i32, i32, i32) {
    %c0_i32 = arith.constant 0 : i32
    %c0_i32_0 = arith.constant 0 : i32
    return %arg0, %arg1, %c0_i32 : i32, i32, i32
  }
}

</mosaic_0001>

<bundles_post_ra>
// kernel: tpu_custom_call.1
= control target key start
LH: loop header
LB: loop body
LE: loop exit
PB: predicated region body
PF: predicated region fallthrough
CT: control target
= control target key end

     0   :  { %s1385_s0 = inlined_call_operand.vmem [shape: f32[2,16,128], index: 0, kind: input, shape index: {}]   ;;  %s1386_s1 = inlined_call_operand.vmem [shape: f32[2,16,128], index: 1, kind: input, shape index: {}]   ;;  %s1387_s2 = inlined_call_operand.vmem [shape: f32[128,32], index: 2, kind: input, shape index: {}]   ;;  %s1388_s3 = inlined_call_operand.vmem [shape: f32[1,32], index: 3, kind: input, shape index: {}]   ;;  %s1389_s4 = inlined_call_operand.vmem [shape: f32[128,32], index: 4, kind: input, shape index: {}]   ;;  %s1390_s5 = inlined_call_operand.vmem [shape: f32[1,32], index: 5, kind: input, shape index: {}]   ;;  %s1391_s6 = inlined_call_operand.hbm [shape: f32[2,16,32], index: 6, kind: output, shape index: {0}]   ;;  %s1392_s7 = inlined_call_operand.hbm [shape: f32[2,16,32], index: 7, kind: output, shape index: {1}]  }
   0x1   :  { %1394 = sst [smem:[#allocation9_spill]] %s1385_s0 }
   0x2   :  { %1395 = sst [smem:[#allocation10_spill]] %s1386_s1 }
   0x3   :  { %13 = vsyncpa [#allocation3], 0 }
   0x4   :  { %15 = vsyncpa [#allocation3 + $0x1], 0 }
   0x5   :  { %16 = vsyncpa [#allocation5], 0 }
   0x6   :  { %18 = vsyncpa [#allocation5 + $0x1], 0  ;;  %s1074_s24 = smov 0   ;;  %s1076_s25 = smov 0  }
   0x7   :  { %s1078_s26 = smov 0   ;;  %s1080_s27 = smov 0  }
   0x8   :  { %s1082_s28 = smov 0   ;;  %s1084_s29 = smov 0  }
   0x9   :  { %s1086_s30 = smov 0   ;;  %s1088_s8 = smov 0  }
   0xa LB: > { %s703_s9 = sadd.s32 4294967295, %s1028_s8   ;;  %s704_s10 = sadd.s32 4294967294, %s1028_s8   ;;  %s1028_s8 = sphi %s1088_s8, %s24_s8   ;;  %s1024_s30 = sphi %s1086_s30, %s1408_s30   ;;  %s1020_s29 = sphi %s1084_s29, %s1407_s29   ;;  %s1016_s28 = sphi %s1082_s28, %s1406_s28   ;;  %s1012_s27 = sphi %s1080_s27, %s1405_s27   ;;  %s1008_s26 = sphi %s1078_s26, %s1404_s26   ;;  %s1004_s25 = sphi %s1076_s25, %s1403_s25   ;;  %s1000_s24 = sphi %s1074_s24, %s1402_s24  }
   0xb   : > { %s33_s11 = sadd.s32 1, %s1020_s29  ;;  %s36_s12 = sadd.s32 1, %s1024_s30 }
   0xc   : > { %p34_p0 = scmp.ge.s32.totalorder %s33_s11, 2  ;;  %p195_p1 = scmp.ne.s32.totalorder %s1008_s26, %s1004_s25 }
   0xd   : > { %p196_p2 = scmp.eq.s32.totalorder %s703_s9, 3  ;;  %p201_p5 = scmp.ne.s32.totalorder %s1004_s25, %s1000_s24 }
   0xe   : > { %s1410_s11 = smov (%p34_p0, %s33_s11), 0  ;;  %s1412_s12 = smov (!%p34_p0, %s36_s12), %s1024_s30 }
   0xf   : > { %s181_s13 = ssub.s32 %s1020_s29, %s1410_s11  ;;  %p1125_p3 = por %p196_p2, %p195_p1 }
  0x10   : > { %p38_p4 = scmp.ge.s32.totalorder %s1412_s12, 2  ;;  %p202_p6 = scmp.eq.s32.totalorder %s704_s10, 3 }
  0x11   : > { %p707_p7 = scmp.ge.s32.totalorder %s1028_s8, 1  ;;  %p282_p9 = scmp.lt.s32.totalorder %s1028_s8, 5 }
  0x12   : > { %s1414_s12 = smov (%p38_p4, %s1412_s12), 0  ;;  %p1134_p8 = por %p202_p6, %p201_p5 }
  0x13   : > { %1397 = sst [smem:[#allocation8_spill]] %s1414_s12  ;;  %s180_s16 = ssub.s32 %s1024_s30, %s1414_s12 }
  0x14   : > { %s185_s17 = sadd.s32 1, %s1008_s26  ;;  %s182_s18 = sor.u32 %s181_s13, %s180_s16 }
  0x15   : > { %p283_p10 = pnand %p707_p7, %p282_p9  ;;  %p183_p11 = scmp.eq.s32.totalorder %s182_s18, 0 }
  0x16   : > { %p330_p12 = scmp.lt.s32.totalorder (!%p283_p10), %s1016_s28, 1  ;;  %p332_p13 = scmp.lt.s32.totalorder (!%p283_p10), %s1012_s27, 1 }
  0x17   : > { %s1143_s19 = scalar_select %p183_p11, %s1008_s26, %s185_s17  }
  0x18   : > { %286 = sbr.rel (%p283_p10) target bundleno = 293 (0x125), region = 44  ;;  %s1399_s0 = sld [smem:[#allocation9_spill]] (!%p283_p10) }
  0x19   : > { %s1400_s1 = sld [smem:[#allocation10_spill]] (!%p283_p10)  ;;  %s718_s10 = sshll.u32 (!%p283_p10), %s1016_s28, 1 }
  0x1d   : > { %v362_v0 = vld [vmem:[%s1387_s2 + $0x78] sm:$0xff]  ;;  %v1030_v2 = vmov 0.0   ;;  %v361_v3 = vld [vmem:[%s1387_s2 + $0x70] sm:$0xff]  ;;  %v360_v5 = vld [vmem:[%s1387_s2 + $0x68] sm:$0xff]  ;;  %s331_s13 = scalar_select %p330_p12, %s1016_s28, 1  ;;  %vm1031_vm0 = vmmov 0  }
  0x1e   : > { %v458_v1 = vld [vmem:[%s1389_s4 + $0x78] sm:$0xff]  ;;  %758 = vmatprep.subr.mxu0 %v1030_v2  ;;  %793 = vmatprep.subr.mxu1 %v1030_v2  ;;  %v457_v4 = vld [vmem:[%s1389_s4 + $0x70] sm:$0xff]  ;;  %v456_v6 = vld [vmem:[%s1389_s4 + $0x68] sm:$0xff]  ;;  %s333_s21 = scalar_select %p332_p13, %s1012_s27, 1  ;;  %vm440_vm1 = vcmask 261120  }
  0x1f   : > { %759 = vmatpush3.msra.mxu0 %v362_v0  ;;  %794 = vmatpush3.msra.mxu1 %v458_v1  ;;  %v359_v7 = vld [vmem:[%s1387_s2 + $0x60] sm:$0xff]  ;;  %v358_v9 = vld [vmem:[%s1387_s2 + $0x58] sm:$0xff]  ;;  %v357_v11 = vld [vmem:[%s1387_s2 + $0x50] sm:$0xff]  ;;  %s710_s16 = sshll.u32 %s331_s13, 1 }
  0x20   : > { %760 = vmatprep.subr.mxu0 %v1030_v2  ;;  %795 = vmatprep.subr.mxu1 %v1030_v2  ;;  %v455_v8 = vld [vmem:[%s1389_s4 + $0x60] sm:$0xff]  ;;  %v454_v10 = vld [vmem:[%s1389_s4 + $0x58] sm:$0xff]  ;;  %v453_v12 = vld [vmem:[%s1389_s4 + $0x50] sm:$0xff]  ;;  %s335_s22 = sadd.s32 %s710_s16, %s333_s21  ;;  %s554_s21 = sadd.s32 %s1012_s27, %s718_s10 }
  0x21   : > { %761 = vmatpush3.msra.mxu0 %v361_v3  ;;  %796 = vmatpush3.msra.mxu1 %v457_v4  ;;  %v356_v13 = vld [vmem:[%s1387_s2 + $0x48] sm:$0xff]  ;;  %v355_v15 = vld [vmem:[%s1387_s2 + $0x40] sm:$0xff]  ;;  %v354_v17 = vld [vmem:[%s1387_s2 + $0x38] sm:$0xff]  ;;  %s711_s18 = sshll.u32 %s335_s22, 3  ;;  %s719_s16 = sshll.u32 %s554_s21, 7 }
  0x22   : > { %762 = vmatprep.subr.mxu0 %v1030_v2  ;;  %797 = vmatprep.subr.mxu1 %v1030_v2  ;;  %v452_v14 = vld [vmem:[%s1389_s4 + $0x48] sm:$0xff]  ;;  %v451_v16 = vld [vmem:[%s1389_s4 + $0x40] sm:$0xff]  ;;  %v450_v18 = vld [vmem:[%s1389_s4 + $0x38] sm:$0xff]  ;;  %s337_s22 = scalar_lea.vmem %s1399_s0, %s711_s18  ;;  %s345_s17 = scalar_lea.vmem %s1400_s1, %s711_s18 }
  0x23   : > { %763 = vmatpush3.msra.mxu0 %v360_v5  ;;  %798 = vmatpush3.msra.mxu1 %v456_v6  ;;  %v353_v19 = vld [vmem:[%s1387_s2 + $0x30] sm:$0xff]  ;;  %v352_v21 = vld [vmem:[%s1387_s2 + $0x28] sm:$0xff]  ;;  %v351_v23 = vld [vmem:[%s1387_s2 + $0x20] sm:$0xff]  ;;  %s1290_s18 = sand.u32 1, %s1004_s25   ;;  %s1304_s10 = scalar_lea.hbm %s1391_s6, %s719_s16 }
  0x24   : > { %764 = vmatprep.subr.mxu0 %v1030_v2  ;;  %799 = vmatprep.subr.mxu1 %v1030_v2  ;;  %v449_v20 = vld [vmem:[%s1389_s4 + $0x30] sm:$0xff]  ;;  %v448_v22 = vld [vmem:[%s1389_s4 + $0x28] sm:$0xff]  ;;  %v447_v24 = vld [vmem:[%s1389_s4 + $0x20] sm:$0xff]  ;;  %s708_s12 = sshll.u32 %s1290_s18, 3  ;;  %s1311_s20 = scalar_lea.hbm %s1392_s7, %s719_s16 }
  0x25   : > { %765 = vmatpush3.msra.mxu0 %v359_v7  ;;  %800 = vmatpush3.msra.mxu1 %v455_v8  ;;  %v350_v25 = vld [vmem:[%s1387_s2 + $0x18] sm:$0xff]  ;;  %v349_v27 = vld [vmem:[%s1387_s2 + $0x10] sm:$0xff]  ;;  %v348_v29 = vld [vmem:[%s1387_s2 + $0x8] sm:$0xff]  ;;  %s322_s23 = scalar_lea.vmem [#allocation2], %s708_s12  ;;  %s329_s0 = scalar_lea.vmem [#allocation4], %s708_s12 }
  0x26   : > { %766 = vmatprep.subr.mxu0 %v1030_v2  ;;  %801 = vmatprep.subr.mxu1 %v1030_v2  ;;  %v446_v26 = vld [vmem:[%s1389_s4 + $0x18] sm:$0xff]  ;;  %v445_v28 = vld [vmem:[%s1389_s4 + $0x10] sm:$0xff]  ;;  %v444_v30 = vld [vmem:[%s1389_s4 + $0x8] sm:$0xff]  ;;  %s558_s9 = sshll.u32 %s322_s23, 4  ;;  %s573_s1 = sshll.u32 %s329_s0, 4  ;;  %s1306_s9 = int_to_ptr.vmem [resolvable:$true] %s558_s9  ;;  %s1313_s1 = int_to_ptr.vmem [resolvable:$true] %s573_s1 }
  0x27   : > { %767 = vmatpush3.msra.mxu0 %v358_v9  ;;  %802 = vmatpush3.msra.mxu1 %v454_v10  ;;  %v347_v31 = vld [vmem:[%s1387_s2] sm:$0xff]  ;;  %s538_s13 = scalar_lea.sflag [#allocation3], %s1290_s18 }
  0x28   : > { %768 = vmatprep.subr.mxu0 %v1030_v2  ;;  %803 = vmatprep.subr.mxu1 %v1030_v2  ;;  %v443_v32 = vld [vmem:[%s1389_s4] sm:$0xff] }
  0x29   : > { %769 = vmatpush3.msra.mxu0 %v357_v11  ;;  %804 = vmatpush3.msra.mxu1 %v453_v12  ;;  %v346_v33 = vld [vmem:[%s337_s22] sm:$0xff]  ;;  %s906_s22 = scalar_lea.vmem %s1306_s9, 128 }
  0x2a   : > { %770 = vmatprep.subr.mxu0 %v1030_v2  ;;  %805 = vmatprep.subr.mxu1 %v1030_v2  ;;  %v442_v34 = vld [vmem:[%s345_s17] sm:$0xff]  ;;  %p907_p0 = scmp.ne.s32.totalorder %s1306_s9, %s906_s22  ;;  %s1032_s17 = smov [#allocation2]  }
  0x2b   : > { %771 = vmatpush3.msra.mxu0 %v356_v13  ;;  %806 = vmatpush3.msra.mxu1 %v452_v14  ;;  %v714_v35 = vld [vmem:[%s1388_s3] ss:$0 sm:$0xff]  ;;  %s910_s28 = sshll.u32 %s1032_s17, 4  ;;  %s911_s28 = int_to_ptr.vmem [resolvable:$false] %s910_s28 }
  0x2c   : > { %772 = vmatprep.subr.mxu0 %v1030_v2  ;;  %807 = vmatprep.subr.mxu1 %v1030_v2  ;;  %v715_v36 = vld [vmem:[%s1390_s5] ss:$0 sm:$0xff]  ;;  %p908_p1 = pnand %p907_p0, %p1125_p3  ;;  %s912_s27 = scalar_lea.vmem %s911_s28, 256 }
  0x2d   : > { %773 = vmatpush3.msra.mxu0 %v355_v15  ;;  %808 = vmatpush3.msra.mxu1 %v451_v16  ;;  %p913_p4 = scmp.lt.s32.totalorder %s1306_s9, %s911_s28  ;;  %p914_p5 = scmp.lt.s32.totalorder %s912_s27, %s906_s22 }
  0x2e   : > { %774 = vmatprep.subr.mxu0 %v1030_v2  ;;  %809 = vmatprep.subr.mxu1 %v1030_v2  ;;  %p909_p2 = pneg %p908_p1 }
  0x2f   : > { %775 = vmatpush3.msra.mxu0 %v354_v17  ;;  %810 = vmatpush3.msra.mxu1 %v450_v18  ;;  %p915_p6 = por %p914_p5, %p913_p4 }
  0x30   : > { %776 = vmatprep.subr.mxu0 %v1030_v2  ;;  %811 = vmatprep.subr.mxu1 %v1030_v2 }
  0x31   : > { %777 = vmatpush3.msra.mxu0 %v353_v19  ;;  %812 = vmatpush3.msra.mxu1 %v449_v20  ;;  %p916_p7 = pnand %p915_p6, %p909_p2 }
  0x32   : > { %778 = vmatprep.subr.mxu0 %v1030_v2  ;;  %813 = vmatprep.subr.mxu1 %v1030_v2 }
  0x33   : > { %779 = vmatpush3.msra.mxu0 %v352_v21  ;;  %814 = vmatpush3.msra.mxu1 %v448_v22 }
  0x34   : > { %780 = vmatprep.subr.mxu0 %v1030_v2  ;;  %815 = vmatprep.subr.mxu1 %v1030_v2 }
  0x35   : > { %781 = vmatpush3.msra.mxu0 %v351_v23  ;;  %816 = vmatpush3.msra.mxu1 %v447_v24 }
  0x36   : > { %782 = vmatprep.subr.mxu0 %v1030_v2  ;;  %817 = vmatprep.subr.mxu1 %v1030_v2 }
  0x37   : > { %783 = vmatpush3.msra.mxu0 %v350_v25  ;;  %818 = vmatpush3.msra.mxu1 %v446_v26 }
  0x38   : > { %784 = vmatprep.subr.mxu0 %v1030_v2  ;;  %819 = vmatprep.subr.mxu1 %v1030_v2 }
  0x39   : > { %785 = vmatpush3.msra.mxu0 %v349_v27  ;;  %820 = vmatpush3.msra.mxu1 %v445_v28 }
  0x3a   : > { %786 = vmatprep.subr.mxu0 %v1030_v2  ;;  %821 = vmatprep.subr.mxu1 %v1030_v2 }
  0x3b   : > { %787 = vmatpush3.msra.mxu0 %v348_v29  ;;  %822 = vmatpush3.msra.mxu1 %v444_v30 }
  0x3c   : > { %788 = vmatprep.subr.mxu0 %v1030_v2  ;;  %823 = vmatprep.subr.mxu1 %v1030_v2 }
  0x3d   : > { %789 = vmatpush3.msra.mxu0 %v347_v31  ;;  %790 = vmatprep.mubr.msk.f32.mxu0 %vm1031_vm0, %v1030_v2 }
  0x3e   : > { %824 = vmatpush3.msra.mxu1 %v443_v32  ;;  %825 = vmatprep.mubr.msk.f32.mxu1 %vm1031_vm0, %v1030_v2 }
  0x3f   : > { %791 = vmatmul.mubr.f32.vlgmr.msra.gmra.mxu0 %v346_v33  ;;  %826 = vmatmul.mubr.f32.vlgmr.msra.gmra.mxu1 %v442_v34 }
  0xff   : > { %v436_v37 = vpop.f32.mrf.mxu0  ;;  %v532_v38 = vpop.f32.mrf.mxu1 }
 0x100   : > { %v437_v39 = vadd.f32 %v714_v35, %v436_v37  ;;  %v533_v40 = vadd.f32 %v715_v36, %v532_v38 }
 0x101   : > { %v792_v41 = vpop.f32.mrf.mxu0  ;;  %v827_v42 = vpop.f32.mrf.mxu1 }
 0x102   : > { %441 = vst.msk [vmem:[%s322_s23] sm:$0xff] %vm440_vm1, %v437_v39  ;;  %536 = vst.msk [vmem:[%s329_s0] sm:$0xff] %vm440_vm1, %v533_v40 }
 0x103   : > { %919 = shalt.err (!%p916_p7)
}
 0x104   : > { %s920_s0 = scalar_lea.hbm %s1304_s10, 128  ;;  %s924_s12 = scalar_lea.hbm %s1391_s6, 512 }
 0x105   : > { %p921_p9 = scmp.ne.s32.totalorder %s1304_s10, %s920_s0  ;;  %p925_p12 = scmp.lt.s32.totalorder %s1304_s10, %s1391_s6 }
 0x106   : > { %p926_p13 = scmp.lt.s32.totalorder %s924_s12, %s920_s0 }
 0x107   : > { %p922_p10 = pnand %p921_p9, %p1125_p3 }
 0x108   : > { %p927_p0 = por %p926_p13, %p925_p12 }
 0x109   : > { %p923_p11 = pneg %p922_p10 }
 0x10b   : > { %p928_p1 = pnand %p927_p0, %p923_p11 }
 0x10d   : > { %931 = shalt.err (!%p928_p1)
}
 0x10e   : > { %828 = dma.vmem_to_hbm [thread:$0]  (%p1125_p3), %s1306_s9, 128, %s1304_s10, %s538_s13  }
 0x10f   : > { %s543_s22 = scalar_lea.sflag [#allocation5], %s1290_s18  ;;  %s932_s28 = scalar_lea.vmem %s1313_s1, 128 }
 0x110   : > { %p933_p2 = scmp.ne.s32.totalorder %s1313_s1, %s932_s28  ;;  %s1033_s27 = smov [#allocation4]  }
 0x111   : > { %s936_s0 = sshll.u32 %s1033_s27, 4  ;;  %s937_s0 = int_to_ptr.vmem [resolvable:$false] %s936_s0 }
 0x112   : > { %p934_p4 = pnand %p933_p2, %p1125_p3  ;;  %s938_s16 = scalar_lea.vmem %s937_s0, 256 }
 0x113   : > { %p939_p6 = scmp.lt.s32.totalorder %s1313_s1, %s937_s0  ;;  %p940_p7 = scmp.lt.s32.totalorder %s938_s16, %s932_s28 }
 0x114   : > { %p935_p5 = pneg %p934_p4 }
 0x115   : > { %p941_p9 = por %p940_p7, %p939_p6 }
 0x117   : > { %p942_p10 = pnand %p941_p9, %p935_p5 }
 0x119   : > { %945 = shalt.err (!%p942_p10)
}
 0x11a   : > { %s946_s9 = scalar_lea.hbm %s1311_s20, 128  ;;  %s950_s13 = scalar_lea.hbm %s1392_s7, 512 }
 0x11b   : > { %p947_p11 = scmp.ne.s32.totalorder %s1311_s20, %s946_s9  ;;  %p951_p0 = scmp.lt.s32.totalorder %s1311_s20, %s1392_s7 }
 0x11c   : > { %p952_p1 = scmp.lt.s32.totalorder %s950_s13, %s946_s9 }
 0x11d   : > { %p948_p12 = pnand %p947_p11, %p1125_p3 }
 0x11e   : > { %p953_p2 = por %p952_p1, %p951_p0 }
 0x11f   : > { %p949_p13 = pneg %p948_p12 }
 0x121   : > { %p954_p4 = pnand %p953_p2, %p949_p13 }
 0x123   : > { %957 = shalt.err (!%p954_p4)
}
 0x124   : > { %829 = dma.vmem_to_hbm [thread:$0]  (%p1125_p3), %s1313_s1, 128, %s1311_s20, %s543_s22  }
 0x125 PF: > { %p839_p5 = scmp.ge.s32.totalorder %s1028_s8, 2  ;;  %s585_s21 = sand.u32 1, %s1000_s24  }
 0x126   : > { %s586_s17 = scalar_lea.sflag [#allocation3], %s585_s21 }
 0x127   : > { %p833_p6 = pnand %p839_p5, %p1134_p8 }
 0x129   : > { %p834_p7 = pneg %p833_p6 }
 0x12b   : > { %991 = dma.done.wait (%p834_p7), %s586_s17, 128  }
 0x12c   : > { %993 = vsyncadd (%p834_p7), %s586_s17, 4294967168  ;;  %s595_s28 = scalar_lea.sflag [#allocation5], %s585_s21 }
 0x12d   : > { %995 = dma.done.wait (%p834_p7), %s595_s28, 128  }
 0x12e   : > { %997 = vsyncadd (%p834_p7), %s595_s28, 4294967168  ;;  %s24_s8 = sadd.s32 1, %s1028_s8   ;;  %s1401_s1 = sld [smem:[#allocation8_spill]] }
 0x12f   : > { %p21_p9 = scmp.ge.s32.totalorder %s24_s8, 6   ;;  %s1402_s24 = smov %s1004_s25 }
 0x130   : > { %s1403_s25 = smov %s1008_s26  ;;  %s1404_s26 = smov %s1143_s19 }
 0x131   : > { %s1405_s27 = smov %s1020_s29  ;;  %s1406_s28 = smov %s1024_s30 }
 0x132   : > { %s1407_s29 = smov %s1410_s11  ;;  %23 = sbr.rel (!%p21_p9) target bundleno = 10 (0xa), region = 99 }
 0x134   : > { %s1408_s30 = smov %s1401_s1 }
 0x137   :  { %600 = vsyncpa [#allocation3], 1 }
 0x138   :  { %602 = vsyncpa [#allocation3 + $0x1], 1 }
 0x139   :  { %603 = vsyncpa [#allocation5], 1 }
 0x13a   :  { %605 = vsyncpa [#allocation5 + $0x1], 1 }

// kernel: tpu_custom_call.1
= control target key start
LH: loop header
LB: loop body
LE: loop exit
PB: predicated region body
PF: predicated region fallthrough
CT: control target
= control target key end

     0   :  { %s1385_s0 = inlined_call_operand.vmem [shape: f32[2,16,128], index: 0, kind: input, shape index: {}]   ;;  %s1386_s1 = inlined_call_operand.vmem [shape: f32[2,16,128], index: 1, kind: input, shape index: {}]   ;;  %s1387_s2 = inlined_call_operand.vmem [shape: f32[128,32], index: 2, kind: input, shape index: {}]   ;;  %s1388_s3 = inlined_call_operand.vmem [shape: f32[1,32], index: 3, kind: input, shape index: {}]   ;;  %s1389_s4 = inlined_call_operand.vmem [shape: f32[128,32], index: 4, kind: input, shape index: {}]   ;;  %s1390_s5 = inlined_call_operand.vmem [shape: f32[1,32], index: 5, kind: input, shape index: {}]   ;;  %s1391_s6 = inlined_call_operand.hbm [shape: f32[2,16,32], index: 6, kind: output, shape index: {0}]   ;;  %s1392_s7 = inlined_call_operand.hbm [shape: f32[2,16,32], index: 7, kind: output, shape index: {1}]  }
   0x1   :  { %1394 = sst [smem:[#allocation9_spill]] %s1385_s0 }
   0x2   :  { %1395 = sst [smem:[#allocation10_spill]] %s1386_s1 }
   0x3   :  { %13 = vsyncpa [#allocation3], 0 }
   0x4   :  { %15 = vsyncpa [#allocation3 + $0x1], 0 }
   0x5   :  { %16 = vsyncpa [#allocation5], 0 }
   0x6   :  { %18 = vsyncpa [#allocation5 + $0x1], 0  ;;  %s1074_s24 = smov 0   ;;  %s1076_s25 = smov 0  }
   0x7   :  { %s1078_s26 = smov 0   ;;  %s1080_s27 = smov 0  }
   0x8   :  { %s1082_s28 = smov 0   ;;  %s1084_s29 = smov 0  }
   0x9   :  { %s1086_s30 = smov 0   ;;  %s1088_s8 = smov 0  }
   0xa LB: > { %s703_s9 = sadd.s32 4294967295, %s1028_s8   ;;  %s704_s10 = sadd.s32 4294967294, %s1028_s8   ;;  %s1028_s8 = sphi %s1088_s8, %s24_s8   ;;  %s1024_s30 = sphi %s1086_s30, %s1408_s30   ;;  %s1020_s29 = sphi %s1084_s29, %s1407_s29   ;;  %s1016_s28 = sphi %s1082_s28, %s1406_s28   ;;  %s1012_s27 = sphi %s1080_s27, %s1405_s27   ;;  %s1008_s26 = sphi %s1078_s26, %s1404_s26   ;;  %s1004_s25 = sphi %s1076_s25, %s1403_s25   ;;  %s1000_s24 = sphi %s1074_s24, %s1402_s24  }
   0xb   : > { %s33_s11 = sadd.s32 1, %s1020_s29  ;;  %s36_s12 = sadd.s32 1, %s1024_s30 }
   0xc   : > { %p34_p0 = scmp.ge.s32.totalorder %s33_s11, 2  ;;  %p195_p1 = scmp.ne.s32.totalorder %s1008_s26, %s1004_s25 }
   0xd   : > { %p196_p2 = scmp.eq.s32.totalorder %s703_s9, 3  ;;  %p201_p5 = scmp.ne.s32.totalorder %s1004_s25, %s1000_s24 }
   0xe   : > { %s1410_s11 = smov (%p34_p0, %s33_s11), 0  ;;  %s1412_s12 = smov (!%p34_p0, %s36_s12), %s1024_s30 }
   0xf   : > { %s181_s13 = ssub.s32 %s1020_s29, %s1410_s11  ;;  %p1125_p3 = por %p196_p2, %p195_p1 }
  0x10   : > { %p38_p4 = scmp.ge.s32.totalorder %s1412_s12, 2  ;;  %p202_p6 = scmp.eq.s32.totalorder %s704_s10, 3 }
  0x11   : > { %p707_p7 = scmp.ge.s32.totalorder %s1028_s8, 1  ;;  %p282_p9 = scmp.lt.s32.totalorder %s1028_s8, 5 }
  0x12   : > { %s1414_s12 = smov (%p38_p4, %s1412_s12), 0  ;;  %p1134_p8 = por %p202_p6, %p201_p5 }
  0x13   : > { %1397 = sst [smem:[#allocation8_spill]] %s1414_s12  ;;  %s180_s16 = ssub.s32 %s1024_s30, %s1414_s12 }
  0x14   : > { %s185_s17 = sadd.s32 1, %s1008_s26  ;;  %s182_s18 = sor.u32 %s181_s13, %s180_s16 }
  0x15   : > { %p283_p10 = pnand %p707_p7, %p282_p9  ;;  %p183_p11 = scmp.eq.s32.totalorder %s182_s18, 0 }
  0x16   : > { %p330_p12 = scmp.lt.s32.totalorder (!%p283_p10), %s1016_s28, 1  ;;  %p332_p13 = scmp.lt.s32.totalorder (!%p283_p10), %s1012_s27, 1 }
  0x17   : > { %s1143_s19 = scalar_select %p183_p11, %s1008_s26, %s185_s17  }
  0x18   : > { %286 = sbr.rel (%p283_p10) target bundleno = 293 (0x125), region = 44  ;;  %s1399_s0 = sld [smem:[#allocation9_spill]] (!%p283_p10) }
  0x19   : > { %s1400_s1 = sld [smem:[#allocation10_spill]] (!%p283_p10)  ;;  %s718_s10 = sshll.u32 (!%p283_p10), %s1016_s28, 1 }
  0x1d   : > { %v362_v0 = vld [vmem:[%s1387_s2 + $0x78] sm:$0xff]  ;;  %v1030_v2 = vmov 0.0   ;;  %v361_v3 = vld [vmem:[%s1387_s2 + $0x70] sm:$0xff]  ;;  %v360_v5 = vld [vmem:[%s1387_s2 + $0x68] sm:$0xff]  ;;  %s331_s13 = scalar_select %p330_p12, %s1016_s28, 1  ;;  %vm1031_vm0 = vmmov 0  }
  0x1e   : > { %v458_v1 = vld [vmem:[%s1389_s4 + $0x78] sm:$0xff]  ;;  %758 = vmatprep.subr.mxu0 %v1030_v2  ;;  %793 = vmatprep.subr.mxu1 %v1030_v2  ;;  %v457_v4 = vld [vmem:[%s1389_s4 + $0x70] sm:$0xff]  ;;  %v456_v6 = vld [vmem:[%s1389_s4 + $0x68] sm:$0xff]  ;;  %s333_s21 = scalar_select %p332_p13, %s1012_s27, 1  ;;  %vm440_vm1 = vcmask 261120  }
  0x1f   : > { %759 = vmatpush3.msra.mxu0 %v362_v0  ;;  %794 = vmatpush3.msra.mxu1 %v458_v1  ;;  %v359_v7 = vld [vmem:[%s1387_s2 + $0x60] sm:$0xff]  ;;  %v358_v9 = vld [vmem:[%s1387_s2 + $0x58] sm:$0xff]  ;;  %v357_v11 = vld [vmem:[%s1387_s2 + $0x50] sm:$0xff]  ;;  %s710_s16 = sshll.u32 %s331_s13, 1 }
  0x20   : > { %760 = vmatprep.subr.mxu0 %v1030_v2  ;;  %795 = vmatprep.subr.mxu1 %v1030_v2  ;;  %v455_v8 = vld [vmem:[%s1389_s4 + $0x60] sm:$0xff]  ;;  %v454_v10 = vld [vmem:[%s1389_s4 + $0x58] sm:$0xff]  ;;  %v453_v12 = vld [vmem:[%s1389_s4 + $0x50] sm:$0xff]  ;;  %s335_s22 = sadd.s32 %s710_s16, %s333_s21  ;;  %s554_s21 = sadd.s32 %s1012_s27, %s718_s10 }
  0x21   : > { %761 = vmatpush3.msra.mxu0 %v361_v3  ;;  %796 = vmatpush3.msra.mxu1 %v457_v4  ;;  %v356_v13 = vld [vmem:[%s1387_s2 + $0x48] sm:$0xff]  ;;  %v355_v15 = vld [vmem:[%s1387_s2 + $0x40] sm:$0xff]  ;;  %v354_v17 = vld [vmem:[%s1387_s2 + $0x38] sm:$0xff]  ;;  %s711_s18 = sshll.u32 %s335_s22, 3  ;;  %s719_s16 = sshll.u32 %s554_s21, 7 }
  0x22   : > { %762 = vmatprep.subr.mxu0 %v1030_v2  ;;  %797 = vmatprep.subr.mxu1 %v1030_v2  ;;  %v452_v14 = vld [vmem:[%s1389_s4 + $0x48] sm:$0xff]  ;;  %v451_v16 = vld [vmem:[%s1389_s4 + $0x40] sm:$0xff]  ;;  %v450_v18 = vld [vmem:[%s1389_s4 + $0x38] sm:$0xff]  ;;  %s337_s22 = scalar_lea.vmem %s1399_s0, %s711_s18  ;;  %s345_s17 = scalar_lea.vmem %s1400_s1, %s711_s18 }
  0x23   : > { %763 = vmatpush3.msra.mxu0 %v360_v5  ;;  %798 = vmatpush3.msra.mxu1 %v456_v6  ;;  %v353_v19 = vld [vmem:[%s1387_s2 + $0x30] sm:$0xff]  ;;  %v352_v21 = vld [vmem:[%s1387_s2 + $0x28] sm:$0xff]  ;;  %v351_v23 = vld [vmem:[%s1387_s2 + $0x20] sm:$0xff]  ;;  %s1290_s18 = sand.u32 1, %s1004_s25   ;;  %s1304_s10 = scalar_lea.hbm %s1391_s6, %s719_s16 }
  0x24   : > { %764 = vmatprep.subr.mxu0 %v1030_v2  ;;  %799 = vmatprep.subr.mxu1 %v1030_v2  ;;  %v449_v20 = vld [vmem:[%s1389_s4 + $0x30] sm:$0xff]  ;;  %v448_v22 = vld [vmem:[%s1389_s4 + $0x28] sm:$0xff]  ;;  %v447_v24 = vld [vmem:[%s1389_s4 + $0x20] sm:$0xff]  ;;  %s708_s12 = sshll.u32 %s1290_s18, 3  ;;  %s1311_s20 = scalar_lea.hbm %s1392_s7, %s719_s16 }
  0x25   : > { %765 = vmatpush3.msra.mxu0 %v359_v7  ;;  %800 = vmatpush3.msra.mxu1 %v455_v8  ;;  %v350_v25 = vld [vmem:[%s1387_s2 + $0x18] sm:$0xff]  ;;  %v349_v27 = vld [vmem:[%s1387_s2 + $0x10] sm:$0xff]  ;;  %v348_v29 = vld [vmem:[%s1387_s2 + $0x8] sm:$0xff]  ;;  %s322_s23 = scalar_lea.vmem [#allocation2], %s708_s12  ;;  %s329_s0 = scalar_lea.vmem [#allocation4], %s708_s12 }
  0x26   : > { %766 = vmatprep.subr.mxu0 %v1030_v2  ;;  %801 = vmatprep.subr.mxu1 %v1030_v2  ;;  %v446_v26 = vld [vmem:[%s1389_s4 + $0x18] sm:$0xff]  ;;  %v445_v28 = vld [vmem:[%s1389_s4 + $0x10] sm:$0xff]  ;;  %v444_v30 = vld [vmem:[%s1389_s4 + $0x8] sm:$0xff]  ;;  %s558_s9 = sshll.u32 %s322_s23, 4  ;;  %s573_s1 = sshll.u32 %s329_s0, 4  ;;  %s1306_s9 = int_to_ptr.vmem [resolvable:$true] %s558_s9  ;;  %s1313_s1 = int_to_ptr.vmem [resolvable:$true] %s573_s1 }
  0x27   : > { %767 = vmatpush3.msra.mxu0 %v358_v9  ;;  %802 = vmatpush3.msra.mxu1 %v454_v10  ;;  %v347_v31 = vld [vmem:[%s1387_s2] sm:$0xff]  ;;  %s538_s13 = scalar_lea.sflag [#allocation3], %s1290_s18 }
  0x28   : > { %768 = vmatprep.subr.mxu0 %v1030_v2  ;;  %803 = vmatprep.subr.mxu1 %v1030_v2  ;;  %v443_v32 = vld [vmem:[%s1389_s4] sm:$0xff] }
  0x29   : > { %769 = vmatpush3.msra.mxu0 %v357_v11  ;;  %804 = vmatpush3.msra.mxu1 %v453_v12  ;;  %v346_v33 = vld [vmem:[%s337_s22] sm:$0xff]  ;;  %s906_s22 = scalar_lea.vmem %s1306_s9, 128 }
  0x2a   : > { %770 = vmatprep.subr.mxu0 %v1030_v2  ;;  %805 = vmatprep.subr.mxu1 %v1030_v2  ;;  %v442_v34 = vld [vmem:[%s345_s17] sm:$0xff]  ;;  %p907_p0 = scmp.ne.s32.totalorder %s1306_s9, %s906_s22  ;;  %s1032_s17 = smov [#allocation2]  }
  0x2b   : > { %771 = vmatpush3.msra.mxu0 %v356_v13  ;;  %806 = vmatpush3.msra.mxu1 %v452_v14  ;;  %v714_v35 = vld [vmem:[%s1388_s3] ss:$0 sm:$0xff]  ;;  %s910_s28 = sshll.u32 %s1032_s17, 4  ;;  %s911_s28 = int_to_ptr.vmem [resolvable:$false] %s910_s28 }
  0x2c   : > { %772 = vmatprep.subr.mxu0 %v1030_v2  ;;  %807 = vmatprep.subr.mxu1 %v1030_v2  ;;  %v715_v36 = vld [vmem:[%s1390_s5] ss:$0 sm:$0xff]  ;;  %p908_p1 = pnand %p907_p0, %p1125_p3  ;;  %s912_s27 = scalar_lea.vmem %s911_s28, 256 }
  0x2d   : > { %773 = vmatpush3.msra.mxu0 %v355_v15  ;;  %808 = vmatpush3.msra.mxu1 %v451_v16  ;;  %p913_p4 = scmp.lt.s32.totalorder %s1306_s9, %s911_s28  ;;  %p914_p5 = scmp.lt.s32.totalorder %s912_s27, %s906_s22 }
  0x2e   : > { %774 = vmatprep.subr.mxu0 %v1030_v2  ;;  %809 = vmatprep.subr.mxu1 %v1030_v2  ;;  %p909_p2 = pneg %p908_p1 }
  0x2f   : > { %775 = vmatpush3.msra.mxu0 %v354_v17  ;;  %810 = vmatpush3.msra.mxu1 %v450_v18  ;;  %p915_p6 = por %p914_p5, %p913_p4 }
  0x30   : > { %776 = vmatprep.subr.mxu0 %v1030_v2  ;;  %811 = vmatprep.subr.mxu1 %v1030_v2 }
  0x31   : > { %777 = vmatpush3.msra.mxu0 %v353_v19  ;;  %812 = vmatpush3.msra.mxu1 %v449_v20  ;;  %p916_p7 = pnand %p915_p6, %p909_p2 }
  0x32   : > { %778 = vmatprep.subr.mxu0 %v1030_v2  ;;  %813 = vmatprep.subr.mxu1 %v1030_v2 }
  0x33   : > { %779 = vmatpush3.msra.mxu0 %v352_v21  ;;  %814 = vmatpush3.msra.mxu1 %v448_v22 }
  0x34   : > { %780 = vmatprep.subr.mxu0 %v1030_v2  ;;  %815 = vmatprep.subr.mxu1 %v1030_v2 }
  0x35   : > { %781 = vmatpush3.msra.mxu0 %v351_v23  ;;  %816 = vmatpush3.msra.mxu1 %v447_v24 }
  0x36   : > { %782 = vmatprep.subr.mxu0 %v1030_v2  ;;  %817 = vmatprep.subr.mxu1 %v1030_v2 }
  0x37   : > { %783 = vmatpush3.msra.mxu0 %v350_v25  ;;  %818 = vmatpush3.msra.mxu1 %v446_v26 }
  0x38   : > { %784 = vmatprep.subr.mxu0 %v1030_v2  ;;  %819 = vmatprep.subr.mxu1 %v1030_v2 }
  0x39   : > { %785 = vmatpush3.msra.mxu0 %v349_v27  ;;  %820 = vmatpush3.msra.mxu1 %v445_v28 }
  0x3a   : > { %786 = vmatprep.subr.mxu0 %v1030_v2  ;;  %821 = vmatprep.subr.mxu1 %v1030_v2 }
  0x3b   : > { %787 = vmatpush3.msra.mxu0 %v348_v29  ;;  %822 = vmatpush3.msra.mxu1 %v444_v30 }
  0x3c   : > { %788 = vmatprep.subr.mxu0 %v1030_v2  ;;  %823 = vmatprep.subr.mxu1 %v1030_v2 }
  0x3d   : > { %789 = vmatpush3.msra.mxu0 %v347_v31  ;;  %790 = vmatprep.mubr.msk.f32.mxu0 %vm1031_vm0, %v1030_v2 }
  0x3e   : > { %824 = vmatpush3.msra.mxu1 %v443_v32  ;;  %825 = vmatprep.mubr.msk.f32.mxu1 %vm1031_vm0, %v1030_v2 }
  0x3f   : > { %791 = vmatmul.mubr.f32.vlgmr.msra.gmra.mxu0 %v346_v33  ;;  %826 = vmatmul.mubr.f32.vlgmr.msra.gmra.mxu1 %v442_v34 }
  0xff   : > { %v436_v37 = vpop.f32.mrf.mxu0  ;;  %v532_v38 = vpop.f32.mrf.mxu1 }
 0x100   : > { %v437_v39 = vadd.f32 %v714_v35, %v436_v37  ;;  %v533_v40 = vadd.f32 %v715_v36, %v532_v38 }
 0x101   : > { %v792_v41 = vpop.f32.mrf.mxu0  ;;  %v827_v42 = vpop.f32.mrf.mxu1 }
 0x102   : > { %441 = vst.msk [vmem:[%s322_s23] sm:$0xff] %vm440_vm1, %v437_v39  ;;  %536 = vst.msk [vmem:[%s329_s0] sm:$0xff] %vm440_vm1, %v533_v40 }
 0x103   : > { %919 = shalt.err (!%p916_p7)
}
 0x104   : > { %s920_s0 = scalar_lea.hbm %s1304_s10, 128  ;;  %s924_s12 = scalar_lea.hbm %s1391_s6, 512 }
 0x105   : > { %p921_p9 = scmp.ne.s32.totalorder %s1304_s10, %s920_s0  ;;  %p925_p12 = scmp.lt.s32.totalorder %s1304_s10, %s1391_s6 }
 0x106   : > { %p926_p13 = scmp.lt.s32.totalorder %s924_s12, %s920_s0 }
 0x107   : > { %p922_p10 = pnand %p921_p9, %p1125_p3 }
 0x108   : > { %p927_p0 = por %p926_p13, %p925_p12 }
 0x109   : > { %p923_p11 = pneg %p922_p10 }
 0x10b   : > { %p928_p1 = pnand %p927_p0, %p923_p11 }
 0x10d   : > { %931 = shalt.err (!%p928_p1)
}
 0x10e   : > { %828 = dma.vmem_to_hbm [thread:$0]  (%p1125_p3), %s1306_s9, 128, %s1304_s10, %s538_s13  }
 0x10f   : > { %s543_s22 = scalar_lea.sflag [#allocation5], %s1290_s18  ;;  %s932_s28 = scalar_lea.vmem %s1313_s1, 128 }
 0x110   : > { %p933_p2 = scmp.ne.s32.totalorder %s1313_s1, %s932_s28  ;;  %s1033_s27 = smov [#allocation4]  }
 0x111   : > { %s936_s0 = sshll.u32 %s1033_s27, 4  ;;  %s937_s0 = int_to_ptr.vmem [resolvable:$false] %s936_s0 }
 0x112   : > { %p934_p4 = pnand %p933_p2, %p1125_p3  ;;  %s938_s16 = scalar_lea.vmem %s937_s0, 256 }
 0x113   : > { %p939_p6 = scmp.lt.s32.totalorder %s1313_s1, %s937_s0  ;;  %p940_p7 = scmp.lt.s32.totalorder %s938_s16, %s932_s28 }
 0x114   : > { %p935_p5 = pneg %p934_p4 }
 0x115   : > { %p941_p9 = por %p940_p7, %p939_p6 }
 0x117   : > { %p942_p10 = pnand %p941_p9, %p935_p5 }
 0x119   : > { %945 = shalt.err (!%p942_p10)
}
 0x11a   : > { %s946_s9 = scalar_lea.hbm %s1311_s20, 128  ;;  %s950_s13 = scalar_lea.hbm %s1392_s7, 512 }
 0x11b   : > { %p947_p11 = scmp.ne.s32.totalorder %s1311_s20, %s946_s9  ;;  %p951_p0 = scmp.lt.s32.totalorder %s1311_s20, %s1392_s7 }
 0x11c   : > { %p952_p1 = scmp.lt.s32.totalorder %s950_s13, %s946_s9 }
 0x11d   : > { %p948_p12 = pnand %p947_p11, %p1125_p3 }
 0x11e   : > { %p953_p2 = por %p952_p1, %p951_p0 }
 0x11f   : > { %p949_p13 = pneg %p948_p12 }
 0x121   : > { %p954_p4 = pnand %p953_p2, %p949_p13 }
 0x123   : > { %957 = shalt.err (!%p954_p4)
}
 0x124   : > { %829 = dma.vmem_to_hbm [thread:$0]  (%p1125_p3), %s1313_s1, 128, %s1311_s20, %s543_s22  }
 0x125 PF: > { %p839_p5 = scmp.ge.s32.totalorder %s1028_s8, 2  ;;  %s585_s21 = sand.u32 1, %s1000_s24  }
 0x126   : > { %s586_s17 = scalar_lea.sflag [#allocation3], %s585_s21 }
 0x127   : > { %p833_p6 = pnand %p839_p5, %p1134_p8 }
 0x129   : > { %p834_p7 = pneg %p833_p6 }
 0x12b   : > { %991 = dma.done.wait (%p834_p7), %s586_s17, 128  }
 0x12c   : > { %993 = vsyncadd (%p834_p7), %s586_s17, 4294967168  ;;  %s595_s28 = scalar_lea.sflag [#allocation5], %s585_s21 }
 0x12d   : > { %995 = dma.done.wait (%p834_p7), %s595_s28, 128  }
 0x12e   : > { %997 = vsyncadd (%p834_p7), %s595_s28, 4294967168  ;;  %s24_s8 = sadd.s32 1, %s1028_s8   ;;  %s1401_s1 = sld [smem:[#allocation8_spill]] }
 0x12f   : > { %p21_p9 = scmp.ge.s32.totalorder %s24_s8, 6   ;;  %s1402_s24 = smov %s1004_s25 }
 0x130   : > { %s1403_s25 = smov %s1008_s26  ;;  %s1404_s26 = smov %s1143_s19 }
 0x131   : > { %s1405_s27 = smov %s1020_s29  ;;  %s1406_s28 = smov %s1024_s30 }
 0x132   : > { %s1407_s29 = smov %s1410_s11  ;;  %23 = sbr.rel (!%p21_p9) target bundleno = 10 (0xa), region = 99 }
 0x134   : > { %s1408_s30 = smov %s1401_s1 }
 0x137   :  { %600 = vsyncpa [#allocation3], 1 }
 0x138   :  { %602 = vsyncpa [#allocation3 + $0x1], 1 }
 0x139   :  { %603 = vsyncpa [#allocation5], 1 }
 0x13a   :  { %605 = vsyncpa [#allocation5 + $0x1], 1 }

</bundles_post_ra>
